<compile_context>
chip_gen: v6e
topology: v6e:2x2x1
jax: 0.10.0
libtpu: 0.0.40
codegen_flags: <defaults>
</compile_context>

<pallas_src>
import functools

import jax
import jax.numpy as jnp
import numpy as np
from jax.experimental import pallas as pl
from jax.experimental.pallas import tpu as pltpu

OUT_ROWS = 8   # 3 output channels padded to 8 sublanes (feature-major output slab)


# ----------------------------------------------------------------------------
# The "map" object from the PyTorch module (positional encoding).
# ----------------------------------------------------------------------------
class PositionalEncodingMap:
    """Fourier-feature map: x -> [x, sin(2^k x), cos(2^k x) for k in range(L)]."""

    def __init__(self, in_dim: int = 3, num_freqs: int = 4):
        self.in_dim = in_dim
        self.num_freqs = num_freqs

    def map_size(self) -> int:
        return self.in_dim * (1 + 2 * self.num_freqs)

    def map(self, x: jnp.ndarray) -> jnp.ndarray:
        feats = [x]
        for k in range(self.num_freqs):
            feats.append(jnp.sin((2.0 ** k) * x))
            feats.append(jnp.cos((2.0 ** k) * x))
        return jnp.concatenate(feats, axis=-1)


def _round_up(x: int, m: int) -> int:
    return (x + m - 1) // m * m


# ----------------------------------------------------------------------------
# Pallas kernel: fused positional encoding + full MLP stack, feature-major.
# ----------------------------------------------------------------------------
def _mlp_kernel(xt_ref, w0x_ref, w0f_ref, b0_ref, wh_ref, bh_ref, wo_ref, bo_ref,
                o_ref, *, depth, num_freqs):
    bf = jnp.bfloat16
    xt = xt_ref[...]                                       # (3, T) f32, lane-dense

    # ---- first layer: x part + per-octave sin/cos parts (bf16 MXU, f32 acc) --
    h = jnp.dot(w0x_ref[...], xt.astype(bf),
                preferred_element_type=jnp.float32)        # (W, T)

    # Base-frequency transcendentals once; octaves via double-angle (VPU only).
    s = jnp.sin(xt)
    c = jnp.cos(xt)
    for k in range(num_freqs):
        if k > 0:
            s, c = 2.0 * s * c, 1.0 - 2.0 * s * s          # sin/cos(2^k x)
        h = h + jnp.dot(w0f_ref[2 * k], s.astype(bf),
                        preferred_element_type=jnp.float32)
        h = h + jnp.dot(w0f_ref[2 * k + 1], c.astype(bf),
                        preferred_element_type=jnp.float32)
    h = jnp.maximum(h + b0_ref[...], 0.0)                  # bias + ReLU in f32

    # ---- hidden Linear + ReLU layers (static unroll, depth is small) ---------
    for i in range(depth):
        h = jnp.dot(wh_ref[i], h.astype(bf),
                    preferred_element_type=jnp.float32)
        h = jnp.maximum(h + bh_ref[i], 0.0)

    # ---- output linear into the (8, T) feature-major slab --------------------
    out = jnp.dot(wo_ref[...], h.astype(bf),
                  preferred_element_type=jnp.float32)
    o_ref[...] = (out + bo_ref[...]).astype(o_ref.dtype)


# ----------------------------------------------------------------------------
# Wrapper: grid over the batch (lane) axis; weights VMEM-resident.
# ----------------------------------------------------------------------------
def mlp_forward(x, params, depth, *, tile_n=4096):
    """x: (N, in_dim) raw points (f32). params: packed/padded kernel params."""
    n, in_dim = x.shape
    width = params["w0x"].shape[0]
    nf2 = params["w0f"].shape[0]
    num_freqs = nf2 // 2
    d_eff = params["wh"].shape[0]                          # >= 1 (dummy when depth == 0)
    out_rows = params["wo"].shape[0]

    tile_n = max(128, min(_round_up(int(tile_n), 128), _round_up(n, 128)))
    n_pad = _round_up(n, tile_n)

    xt = jnp.transpose(x)                                  # (in_dim, N)
    if n_pad != n:
        xt = jnp.pad(xt, ((0, 0), (0, n_pad - n)))

    kernel = functools.partial(_mlp_kernel, depth=depth, num_freqs=num_freqs)

    out_t = pl.pallas_call(
        kernel,
        out_shape=jax.ShapeDtypeStruct((out_rows, n_pad), jnp.float32),
        grid=(n_pad // tile_n,),
        in_specs=[
            pl.BlockSpec((in_dim, tile_n), lambda i: (0, i)),          # x^T tile
            pl.BlockSpec((width, in_dim), lambda i: (0, 0)),           # w0x (resident)
            pl.BlockSpec((nf2, width, in_dim), lambda i: (0, 0, 0)),   # w0 sin/cos blocks
            pl.BlockSpec((width, 1), lambda i: (0, 0)),                # b0
            pl.BlockSpec((d_eff, width, width), lambda i: (0, 0, 0)),  # hidden weights
            pl.BlockSpec((d_eff, width, 1), lambda i: (0, 0, 0)),      # hidden biases
            pl.BlockSpec((out_rows, width), lambda i: (0, 0)),         # wo (padded rows)
            pl.BlockSpec((out_rows, 1), lambda i: (0, 0)),             # bo (padded rows)
        ],
        out_specs=pl.BlockSpec((out_rows, tile_n), lambda i: (0, i)),
        compiler_params=pltpu.CompilerParams(
            dimension_semantics=("parallel",),
            vmem_limit_bytes=32 * 1024 * 1024,
        ),
    )(xt, params["w0x"], params["w0f"], params["b0"],
      params["wh"], params["bh"], params["wo"], params["bo"])

    return jnp.transpose(out_t[:3, :n])                    # (N, 3)


# ----------------------------------------------------------------------------
# Parameter init (mimics PyTorch Linear default U(-1/sqrt(fan_in), ..)).
# ----------------------------------------------------------------------------
def init_params(key, map_size, width, depth):
    def linear_init(k, fan_in, fan_out):
        kw, kb = jax.random.split(k)
        bound = 1.0 / np.sqrt(fan_in)
        w = jax.random.uniform(kw, (fan_in, fan_out), jnp.float32, -bound, bound)
        b = jax.random.uniform(kb, (1, fan_out), jnp.float32, -bound, bound)
        return w, b

    keys = jax.random.split(key, depth + 2)
    w0, b0 = linear_init(keys[0], map_size, width)
    whs, bhs = [], []
    for i in range(depth):
        wi, bi = linear_init(keys[1 + i], width, width)
        whs.append(wi)
        bhs.append(bi)
    wo, bo = linear_init(keys[depth + 1], width, 3)
    return dict(w0=w0, b0=b0, whs=whs, bhs=bhs, wo=wo, bo=bo)


def pack_params_for_kernel(p, width, depth, in_dim=3, num_freqs=4, out_rows=OUT_ROWS):
    """Transpose to feature-major (out, in), split the first layer by feature
    group (x / sin_k / cos_k), pad output rows 3->8; weights bf16, biases f32."""
    w0 = p["w0"]                                            # (map_size, W), rows in map order
    w0x = jnp.transpose(w0[:in_dim, :])                     # (W, in_dim)
    blocks = []
    for k in range(num_freqs):
        base = in_dim * (1 + 2 * k)
        blocks.append(jnp.transpose(w0[base:base + in_dim, :]))              # sin_k
        blocks.append(jnp.transpose(w0[base + in_dim:base + 2 * in_dim, :])) # cos_k
    w0f = jnp.stack(blocks, axis=0)                         # (2*num_freqs, W, in_dim)
    b0 = jnp.transpose(p["b0"])                             # (W, 1)

    if depth > 0:
        wh = jnp.stack([jnp.transpose(w) for w in p["whs"]], axis=0)   # (D, W, W)
        bh = jnp.stack([jnp.transpose(b) for b in p["bhs"]], axis=0)   # (D, W, 1)
    else:  # avoid zero-extent operands in the pallas_call
        wh = jnp.zeros((1, width, width), jnp.float32)
        bh = jnp.zeros((1, width, 1), jnp.float32)

    wo = jnp.zeros((out_rows, width), jnp.float32).at[:3].set(jnp.transpose(p["wo"]))
    bo = jnp.zeros((out_rows, 1), jnp.float32).at[:3].set(jnp.transpose(p["bo"]))

    return {
        "w0x": w0x.astype(jnp.bfloat16),
        "w0f": w0f.astype(jnp.bfloat16),
        "b0": b0,
        "wh": wh.astype(jnp.bfloat16),
        "bh": bh,
        "wo": wo.astype(jnp.bfloat16),
        "bo": bo,
    }


# ----------------------------------------------------------------------------
# References: (a) mirror of the kernel's bf16/f32 math, (b) f32 PyTorch semantics.
# ----------------------------------------------------------------------------
def mlp_reference_bf16(x, packed, depth, num_freqs):
    bf = jnp.bfloat16
    xt = jnp.transpose(x)
    h = jnp.dot(packed["w0x"], xt.astype(bf), preferred_element_type=jnp.float32)
    for k in range(num_freqs):
        xk = (2.0 ** k) * xt
        h = h + jnp.dot(packed["w0f"][2 * k], jnp.sin(xk).astype(bf),
                        preferred_element_type=jnp.float32)
        h = h + jnp.dot(packed["w0f"][2 * k + 1], jnp.cos(xk).astype(bf),
                        preferred_element_type=jnp.float32)
    h = jnp.maximum(h + packed["b0"], 0.0)
    for i in range(depth):
        h = jnp.maximum(jnp.dot(packed["wh"][i], h.astype(bf),
                                preferred_element_type=jnp.float32) + packed["bh"][i], 0.0)
    out = jnp.dot(packed["wo"], h.astype(bf),
                  preferred_element_type=jnp.float32) + packed["bo"]
    return jnp.transpose(out[:3])


def mlp_reference_f32(x, p, depth, num_freqs):
    pe = PositionalEncodingMap(x.shape[-1], num_freqs)
    h = pe.map(x)
    h = jnp.maximum(h @ p["w0"] + p["b0"], 0.0)
    for i in range(depth):
        h = jnp.maximum(h @ p["whs"][i] + p["bhs"][i], 0.0)
    return h @ p["wo"] + p["bo"]


if __name__ == "__main__":
    D = 2          # extra hidden linears (D+1 Linear+ReLU layers total)
    W = 32         # hidden width
    N = 1000       # not a multiple of the tile -> exercises batch padding
    pe = PositionalEncodingMap(in_dim=3, num_freqs=4)   # map_size = 27

    key = jax.random.PRNGKey(0)
    kx, kp = jax.random.split(key)
    x = jax.random.normal(kx, (N, 3), jnp.float32)       # raw 3-D points
    raw = init_params(kp, pe.map_size(), W, D)
    packed = pack_params_for_kernel(raw, W, D, in_dim=3, num_freqs=pe.num_freqs)

    # Small tile in the demo so the grid has several steps (256 | 1024-pad).
    out = mlp_forward(x, packed, D, tile_n=256)
    out = jax.block_until_ready(out)
    assert out.shape == (N, 3)

    # Tight check against a reference mirroring the kernel's bf16/f32 math.
    ref_bf16 = mlp_reference_bf16(x, packed, D, pe.num_freqs)
    np.testing.assert_allclose(np.asarray(out), np.asarray(ref_bf16),
                               rtol=5e-3, atol=5e-3)

    # Looser check against the f32 PyTorch-faithful forward.
    ref_f32 = mlp_reference_f32(x, raw, D, pe.num_freqs)
    np.testing.assert_allclose(np.asarray(out), np.asarray(ref_f32),
                               rtol=3e-2, atol=3e-2)

    print("KERNEL_OK")
</pallas_src>

<mosaic_0001>
module attributes {stable_mosaic.version = 11 : i64} {
  func.func @_mlp_kernel(%arg0: i32, %arg1: memref<3x256xf32, #tpu.memory_space<vmem>>, %arg2: memref<32x3xbf16, #tpu.memory_space<vmem>>, %arg3: memref<8x32x3xbf16, #tpu.memory_space<vmem>>, %arg4: memref<32x1xf32, #tpu.memory_space<vmem>>, %arg5: memref<2x32x32xbf16, #tpu.memory_space<vmem>>, %arg6: memref<2x32x1xf32, #tpu.memory_space<vmem>>, %arg7: memref<8x32xbf16, #tpu.memory_space<vmem>>, %arg8: memref<8x1xf32, #tpu.memory_space<vmem>>, %arg9: memref<8x256xf32, #tpu.memory_space<vmem>>) attributes {dimension_semantics = [#tpu.dimension_semantics<parallel>], iteration_bounds = array<i64: 4>, scalar_prefetch = 0 : i64, scratch_operands = 0 : i64, tpu.core_type = #tpu.core_type<tc>, window_params = [{transform_indices = @transform_0, window_bounds = array<i64: 3, 256>}, {pipeline_mode = #tpu.pipeline_mode<synchronous>, transform_indices = @transform_1, window_bounds = array<i64: 32, 3>}, {pipeline_mode = #tpu.pipeline_mode<synchronous>, transform_indices = @transform_2, window_bounds = array<i64: 8, 32, 3>}, {pipeline_mode = #tpu.pipeline_mode<synchronous>, transform_indices = @transform_3, window_bounds = array<i64: 32, 1>}, {pipeline_mode = #tpu.pipeline_mode<synchronous>, transform_indices = @transform_4, window_bounds = array<i64: 2, 32, 32>}, {pipeline_mode = #tpu.pipeline_mode<synchronous>, transform_indices = @transform_5, window_bounds = array<i64: 2, 32, 1>}, {pipeline_mode = #tpu.pipeline_mode<synchronous>, transform_indices = @transform_6, window_bounds = array<i64: 8, 32>}, {pipeline_mode = #tpu.pipeline_mode<synchronous>, transform_indices = @transform_7, window_bounds = array<i64: 8, 1>}, {transform_indices = @transform_8, window_bounds = array<i64: 8, 256>}]} {
    %c0 = arith.constant 0 : index
    %c0_0 = arith.constant 0 : index
    %0 = vector.load %arg1[%c0, %c0_0] : memref<3x256xf32, #tpu.memory_space<vmem>>, vector<3x256xf32>
    %c0_1 = arith.constant 0 : index
    %c0_2 = arith.constant 0 : index
    %1 = vector.load %arg2[%c0_1, %c0_2] : memref<32x3xbf16, #tpu.memory_space<vmem>>, vector<32x3xbf16>
    %2 = arith.truncf %0 : vector<3x256xf32> to vector<3x256xbf16>
    %cst = arith.constant dense<0.000000e+00> : vector<32x256xf32>
    %3 = tpu.matmul %1, %2, %cst {dimension_numbers = #tpu.dot_dimension_numbers<[1], [0], [0], [1], [0, 0, 1, 1], [], []>} : vector<32x3xbf16>, vector<3x256xbf16>, vector<32x256xf32> -> vector<32x256xf32>
    %4 = math.sin %0 : vector<3x256xf32>
    %5 = math.cos %0 : vector<3x256xf32>
    %c0_3 = arith.constant 0 : index
    %c0_4 = arith.constant 0 : index
    %c0_5 = arith.constant 0 : index
    %6 = vector.load %arg3[%c0_3, %c0_4, %c0_5] : memref<8x32x3xbf16, #tpu.memory_space<vmem>>, vector<1x32x3xbf16>
    %7 = vector.shape_cast %6 : vector<1x32x3xbf16> to vector<32x3xbf16>
    %8 = arith.truncf %4 : vector<3x256xf32> to vector<3x256xbf16>
    %cst_6 = arith.constant dense<0.000000e+00> : vector<32x256xf32>
    %9 = tpu.matmul %7, %8, %cst_6 {dimension_numbers = #tpu.dot_dimension_numbers<[1], [0], [0], [1], [0, 0, 1, 1], [], []>} : vector<32x3xbf16>, vector<3x256xbf16>, vector<32x256xf32> -> vector<32x256xf32>
    %10 = arith.addf %3, %9 : vector<32x256xf32>
    %c1 = arith.constant 1 : index
    %c0_7 = arith.constant 0 : index
    %c0_8 = arith.constant 0 : index
    %11 = vector.load %arg3[%c1, %c0_7, %c0_8] : memref<8x32x3xbf16, #tpu.memory_space<vmem>>, vector<1x32x3xbf16>
    %12 = vector.shape_cast %11 : vector<1x32x3xbf16> to vector<32x3xbf16>
    %13 = arith.truncf %5 : vector<3x256xf32> to vector<3x256xbf16>
    %cst_9 = arith.constant dense<0.000000e+00> : vector<32x256xf32>
    %14 = tpu.matmul %12, %13, %cst_9 {dimension_numbers = #tpu.dot_dimension_numbers<[1], [0], [0], [1], [0, 0, 1, 1], [], []>} : vector<32x3xbf16>, vector<3x256xbf16>, vector<32x256xf32> -> vector<32x256xf32>
    %15 = arith.addf %10, %14 : vector<32x256xf32>
    %cst_10 = arith.constant 2.000000e+00 : f32
    %16 = vector.broadcast %cst_10 : f32 to vector<3x256xf32>
    %17 = arith.mulf %16, %4 : vector<3x256xf32>
    %18 = arith.mulf %17, %5 : vector<3x256xf32>
    %cst_11 = arith.constant 2.000000e+00 : f32
    %19 = vector.broadcast %cst_11 : f32 to vector<3x256xf32>
    %20 = arith.mulf %19, %4 : vector<3x256xf32>
    %21 = arith.mulf %20, %4 : vector<3x256xf32>
    %cst_12 = arith.constant 1.000000e+00 : f32
    %22 = vector.broadcast %cst_12 : f32 to vector<3x256xf32>
    %23 = arith.subf %22, %21 : vector<3x256xf32>
    %c2 = arith.constant 2 : index
    %c0_13 = arith.constant 0 : index
    %c0_14 = arith.constant 0 : index
    %24 = vector.load %arg3[%c2, %c0_13, %c0_14] : memref<8x32x3xbf16, #tpu.memory_space<vmem>>, vector<1x32x3xbf16>
    %25 = vector.shape_cast %24 : vector<1x32x3xbf16> to vector<32x3xbf16>
    %26 = arith.truncf %18 : vector<3x256xf32> to vector<3x256xbf16>
    %cst_15 = arith.constant dense<0.000000e+00> : vector<32x256xf32>
    %27 = tpu.matmul %25, %26, %cst_15 {dimension_numbers = #tpu.dot_dimension_numbers<[1], [0], [0], [1], [0, 0, 1, 1], [], []>} : vector<32x3xbf16>, vector<3x256xbf16>, vector<32x256xf32> -> vector<32x256xf32>
    %28 = arith.addf %15, %27 : vector<32x256xf32>
    %c3 = arith.constant 3 : index
    %c0_16 = arith.constant 0 : index
    %c0_17 = arith.constant 0 : index
    %29 = vector.load %arg3[%c3, %c0_16, %c0_17] : memref<8x32x3xbf16, #tpu.memory_space<vmem>>, vector<1x32x3xbf16>
    %30 = vector.shape_cast %29 : vector<1x32x3xbf16> to vector<32x3xbf16>
    %31 = arith.truncf %23 : vector<3x256xf32> to vector<3x256xbf16>
    %cst_18 = arith.constant dense<0.000000e+00> : vector<32x256xf32>
    %32 = tpu.matmul %30, %31, %cst_18 {dimension_numbers = #tpu.dot_dimension_numbers<[1], [0], [0], [1], [0, 0, 1, 1], [], []>} : vector<32x3xbf16>, vector<3x256xbf16>, vector<32x256xf32> -> vector<32x256xf32>
    %33 = arith.addf %28, %32 : vector<32x256xf32>
    %cst_19 = arith.constant 2.000000e+00 : f32
    %34 = vector.broadcast %cst_19 : f32 to vector<3x256xf32>
    %35 = arith.mulf %34, %18 : vector<3x256xf32>
    %36 = arith.mulf %35, %23 : vector<3x256xf32>
    %cst_20 = arith.constant 2.000000e+00 : f32
    %37 = vector.broadcast %cst_20 : f32 to vector<3x256xf32>
    %38 = arith.mulf %37, %18 : vector<3x256xf32>
    %39 = arith.mulf %38, %18 : vector<3x256xf32>
    %cst_21 = arith.constant 1.000000e+00 : f32
    %40 = vector.broadcast %cst_21 : f32 to vector<3x256xf32>
    %41 = arith.subf %40, %39 : vector<3x256xf32>
    %c4 = arith.constant 4 : index
    %c0_22 = arith.constant 0 : index
    %c0_23 = arith.constant 0 : index
    %42 = vector.load %arg3[%c4, %c0_22, %c0_23] : memref<8x32x3xbf16, #tpu.memory_space<vmem>>, vector<1x32x3xbf16>
    %43 = vector.shape_cast %42 : vector<1x32x3xbf16> to vector<32x3xbf16>
    %44 = arith.truncf %36 : vector<3x256xf32> to vector<3x256xbf16>
    %cst_24 = arith.constant dense<0.000000e+00> : vector<32x256xf32>
    %45 = tpu.matmul %43, %44, %cst_24 {dimension_numbers = #tpu.dot_dimension_numbers<[1], [0], [0], [1], [0, 0, 1, 1], [], []>} : vector<32x3xbf16>, vector<3x256xbf16>, vector<32x256xf32> -> vector<32x256xf32>
    %46 = arith.addf %33, %45 : vector<32x256xf32>
    %c5 = arith.constant 5 : index
    %c0_25 = arith.constant 0 : index
    %c0_26 = arith.constant 0 : index
    %47 = vector.load %arg3[%c5, %c0_25, %c0_26] : memref<8x32x3xbf16, #tpu.memory_space<vmem>>, vector<1x32x3xbf16>
    %48 = vector.shape_cast %47 : vector<1x32x3xbf16> to vector<32x3xbf16>
    %49 = arith.truncf %41 : vector<3x256xf32> to vector<3x256xbf16>
    %cst_27 = arith.constant dense<0.000000e+00> : vector<32x256xf32>
    %50 = tpu.matmul %48, %49, %cst_27 {dimension_numbers = #tpu.dot_dimension_numbers<[1], [0], [0], [1], [0, 0, 1, 1], [], []>} : vector<32x3xbf16>, vector<3x256xbf16>, vector<32x256xf32> -> vector<32x256xf32>
    %51 = arith.addf %46, %50 : vector<32x256xf32>
    %cst_28 = arith.constant 2.000000e+00 : f32
    %52 = vector.broadcast %cst_28 : f32 to vector<3x256xf32>
    %53 = arith.mulf %52, %36 : vector<3x256xf32>
    %54 = arith.mulf %53, %41 : vector<3x256xf32>
    %cst_29 = arith.constant 2.000000e+00 : f32
    %55 = vector.broadcast %cst_29 : f32 to vector<3x256xf32>
    %56 = arith.mulf %55, %36 : vector<3x256xf32>
    %57 = arith.mulf %56, %36 : vector<3x256xf32>
    %cst_30 = arith.constant 1.000000e+00 : f32
    %58 = vector.broadcast %cst_30 : f32 to vector<3x256xf32>
    %59 = arith.subf %58, %57 : vector<3x256xf32>
    %c6 = arith.constant 6 : index
    %c0_31 = arith.constant 0 : index
    %c0_32 = arith.constant 0 : index
    %60 = vector.load %arg3[%c6, %c0_31, %c0_32] : memref<8x32x3xbf16, #tpu.memory_space<vmem>>, vector<1x32x3xbf16>
    %61 = vector.shape_cast %60 : vector<1x32x3xbf16> to vector<32x3xbf16>
    %62 = arith.truncf %54 : vector<3x256xf32> to vector<3x256xbf16>
    %cst_33 = arith.constant dense<0.000000e+00> : vector<32x256xf32>
    %63 = tpu.matmul %61, %62, %cst_33 {dimension_numbers = #tpu.dot_dimension_numbers<[1], [0], [0], [1], [0, 0, 1, 1], [], []>} : vector<32x3xbf16>, vector<3x256xbf16>, vector<32x256xf32> -> vector<32x256xf32>
    %64 = arith.addf %51, %63 : vector<32x256xf32>
    %c7 = arith.constant 7 : index
    %c0_34 = arith.constant 0 : index
    %c0_35 = arith.constant 0 : index
    %65 = vector.load %arg3[%c7, %c0_34, %c0_35] : memref<8x32x3xbf16, #tpu.memory_space<vmem>>, vector<1x32x3xbf16>
    %66 = vector.shape_cast %65 : vector<1x32x3xbf16> to vector<32x3xbf16>
    %67 = arith.truncf %59 : vector<3x256xf32> to vector<3x256xbf16>
    %cst_36 = arith.constant dense<0.000000e+00> : vector<32x256xf32>
    %68 = tpu.matmul %66, %67, %cst_36 {dimension_numbers = #tpu.dot_dimension_numbers<[1], [0], [0], [1], [0, 0, 1, 1], [], []>} : vector<32x3xbf16>, vector<3x256xbf16>, vector<32x256xf32> -> vector<32x256xf32>
    %69 = arith.addf %64, %68 : vector<32x256xf32>
    %c0_37 = arith.constant 0 : index
    %c0_38 = arith.constant 0 : index
    %70 = vector.load %arg4[%c0_37, %c0_38] : memref<32x1xf32, #tpu.memory_space<vmem>>, vector<32x1xf32>
    %71 = vector.broadcast %70 : vector<32x1xf32> to vector<32x256xf32>
    %72 = arith.addf %69, %71 : vector<32x256xf32>
    %cst_39 = arith.constant 0.000000e+00 : f32
    %73 = vector.broadcast %cst_39 : f32 to vector<32x256xf32>
    %74 = arith.maximumf %72, %73 : vector<32x256xf32>
    %c0_40 = arith.constant 0 : index
    %c0_41 = arith.constant 0 : index
    %c0_42 = arith.constant 0 : index
    %75 = vector.load %arg5[%c0_40, %c0_41, %c0_42] : memref<2x32x32xbf16, #tpu.memory_space<vmem>>, vector<1x32x32xbf16>
    %76 = vector.shape_cast %75 : vector<1x32x32xbf16> to vector<32x32xbf16>
    %77 = arith.truncf %74 : vector<32x256xf32> to vector<32x256xbf16>
    %cst_43 = arith.constant dense<0.000000e+00> : vector<32x256xf32>
    %78 = tpu.matmul %76, %77, %cst_43 {dimension_numbers = #tpu.dot_dimension_numbers<[1], [0], [0], [1], [0, 0, 1, 1], [], []>} : vector<32x32xbf16>, vector<32x256xbf16>, vector<32x256xf32> -> vector<32x256xf32>
    %c0_44 = arith.constant 0 : index
    %c0_45 = arith.constant 0 : index
    %c0_46 = arith.constant 0 : index
    %79 = vector.load %arg6[%c0_44, %c0_45, %c0_46] : memref<2x32x1xf32, #tpu.memory_space<vmem>>, vector<1x32x1xf32>
    %80 = vector.shape_cast %79 : vector<1x32x1xf32> to vector<32x1xf32>
    %81 = vector.broadcast %80 : vector<32x1xf32> to vector<32x256xf32>
    %82 = arith.addf %78, %81 : vector<32x256xf32>
    %cst_47 = arith.constant 0.000000e+00 : f32
    %83 = vector.broadcast %cst_47 : f32 to vector<32x256xf32>
    %84 = arith.maximumf %82, %83 : vector<32x256xf32>
    %c1_48 = arith.constant 1 : index
    %c0_49 = arith.constant 0 : index
    %c0_50 = arith.constant 0 : index
    %85 = vector.load %arg5[%c1_48, %c0_49, %c0_50] : memref<2x32x32xbf16, #tpu.memory_space<vmem>>, vector<1x32x32xbf16>
    %86 = vector.shape_cast %85 : vector<1x32x32xbf16> to vector<32x32xbf16>
    %87 = arith.truncf %84 : vector<32x256xf32> to vector<32x256xbf16>
    %cst_51 = arith.constant dense<0.000000e+00> : vector<32x256xf32>
    %88 = tpu.matmul %86, %87, %cst_51 {dimension_numbers = #tpu.dot_dimension_numbers<[1], [0], [0], [1], [0, 0, 1, 1], [], []>} : vector<32x32xbf16>, vector<32x256xbf16>, vector<32x256xf32> -> vector<32x256xf32>
    %c1_52 = arith.constant 1 : index
    %c0_53 = arith.constant 0 : index
    %c0_54 = arith.constant 0 : index
    %89 = vector.load %arg6[%c1_52, %c0_53, %c0_54] : memref<2x32x1xf32, #tpu.memory_space<vmem>>, vector<1x32x1xf32>
    %90 = vector.shape_cast %89 : vector<1x32x1xf32> to vector<32x1xf32>
    %91 = vector.broadcast %90 : vector<32x1xf32> to vector<32x256xf32>
    %92 = arith.addf %88, %91 : vector<32x256xf32>
    %cst_55 = arith.constant 0.000000e+00 : f32
    %93 = vector.broadcast %cst_55 : f32 to vector<32x256xf32>
    %94 = arith.maximumf %92, %93 : vector<32x256xf32>
    %c0_56 = arith.constant 0 : index
    %c0_57 = arith.constant 0 : index
    %95 = vector.load %arg7[%c0_56, %c0_57] : memref<8x32xbf16, #tpu.memory_space<vmem>>, vector<8x32xbf16>
    %96 = arith.truncf %94 : vector<32x256xf32> to vector<32x256xbf16>
    %cst_58 = arith.constant dense<0.000000e+00> : vector<8x256xf32>
    %97 = tpu.matmul %95, %96, %cst_58 {dimension_numbers = #tpu.dot_dimension_numbers<[1], [0], [0], [1], [0, 0, 1, 1], [], []>} : vector<8x32xbf16>, vector<32x256xbf16>, vector<8x256xf32> -> vector<8x256xf32>
    %c0_59 = arith.constant 0 : index
    %c0_60 = arith.constant 0 : index
    %98 = vector.load %arg8[%c0_59, %c0_60] : memref<8x1xf32, #tpu.memory_space<vmem>>, vector<8x1xf32>
    %99 = vector.broadcast %98 : vector<8x1xf32> to vector<8x256xf32>
    %100 = arith.addf %97, %99 : vector<8x256xf32>
    %c0_61 = arith.constant 0 : index
    %c0_62 = arith.constant 0 : index
    %101 = vector.load %arg9[%c0_61, %c0_62] : memref<8x256xf32, #tpu.memory_space<vmem>>, vector<8x256xf32>
    tpu.vector_store %arg9[%c0_61, %c0_62], %100 {strides = array<i32>} : memref<8x256xf32, #tpu.memory_space<vmem>>, vector<8x256xf32>,
    return
  }
  func.func @transform_0(%arg0: i32) -> (i32, i32) {
    %c0_i32 = arith.constant 0 : i32
    %c0_i32_0 = arith.constant 0 : i32
    return %c0_i32, %arg0 : i32, i32
  }
  func.func @transform_1(%arg0: i32) -> (i32, i32) {
    %c0_i32 = arith.constant 0 : i32
    %c0_i32_0 = arith.constant 0 : i32
    %c0_i32_1 = arith.constant 0 : i32
    return %c0_i32, %c0_i32_0 : i32, i32
  }
  func.func @transform_2(%arg0: i32) -> (i32, i32, i32) {
    %c0_i32 = arith.constant 0 : i32
    %c0_i32_0 = arith.constant 0 : i32
    %c0_i32_1 = arith.constant 0 : i32
    %c0_i32_2 = arith.constant 0 : i32
    return %c0_i32, %c0_i32_0, %c0_i32_1 : i32, i32, i32
  }
  func.func @transform_3(%arg0: i32) -> (i32, i32) {
    %c0_i32 = arith.constant 0 : i32
    %c0_i32_0 = arith.constant 0 : i32
    %c0_i32_1 = arith.constant 0 : i32
    return %c0_i32, %c0_i32_0 : i32, i32
  }
  func.func @transform_4(%arg0: i32) -> (i32, i32, i32) {
    %c0_i32 = arith.constant 0 : i32
    %c0_i32_0 = arith.constant 0 : i32
    %c0_i32_1 = arith.constant 0 : i32
    %c0_i32_2 = arith.constant 0 : i32
    return %c0_i32, %c0_i32_0, %c0_i32_1 : i32, i32, i32
  }
  func.func @transform_5(%arg0: i32) -> (i32, i32, i32) {
    %c0_i32 = arith.constant 0 : i32
    %c0_i32_0 = arith.constant 0 : i32
    %c0_i32_1 = arith.constant 0 : i32
    %c0_i32_2 = arith.constant 0 : i32
    return %c0_i32, %c0_i32_0, %c0_i32_1 : i32, i32, i32
  }
  func.func @transform_6(%arg0: i32) -> (i32, i32) {
    %c0_i32 = arith.constant 0 : i32
    %c0_i32_0 = arith.constant 0 : i32
    %c0_i32_1 = arith.constant 0 : i32
    return %c0_i32, %c0_i32_0 : i32, i32
  }
  func.func @transform_7(%arg0: i32) -> (i32, i32) {
    %c0_i32 = arith.constant 0 : i32
    %c0_i32_0 = arith.constant 0 : i32
    %c0_i32_1 = arith.constant 0 : i32
    return %c0_i32, %c0_i32_0 : i32, i32
  }
  func.func @transform_8(%arg0: i32) -> (i32, i32) {
    %c0_i32 = arith.constant 0 : i32
    %c0_i32_0 = arith.constant 0 : i32
    return %c0_i32, %arg0 : i32, i32
  }
}

</mosaic_0001>

<bundles_post_ra>
// kernel: tpu_custom_call.1
= control target key start
LH: loop header
LB: loop body
LE: loop exit
PB: predicated region body
PF: predicated region fallthrough
CT: control target
= control target key end

     0   :  { %13 = vsyncpa [#allocation3], 0  ;;  %s2389_s0 = inlined_call_operand.vmem [shape: f32[3,1024], index: 0, kind: input, shape index: {}]   ;;  %s2390_s1 = inlined_call_operand.vmem [shape: bf16[32,3], index: 1, kind: input, shape index: {}]   ;;  %s2391_s2 = inlined_call_operand.vmem [shape: bf16[8,32,3], index: 2, kind: input, shape index: {}]   ;;  %s2392_s3 = inlined_call_operand.vmem [shape: f32[32,1], index: 3, kind: input, shape index: {}]   ;;  %s2393_s4 = inlined_call_operand.vmem [shape: bf16[2,32,32], index: 4, kind: input, shape index: {}]   ;;  %s2394_s5 = inlined_call_operand.vmem [shape: f32[2,32,1], index: 5, kind: input, shape index: {}]   ;;  %s2395_s6 = inlined_call_operand.vmem [shape: bf16[8,32], index: 6, kind: input, shape index: {}]   ;;  %s2396_s7 = inlined_call_operand.vmem [shape: f32[8,1], index: 7, kind: input, shape index: {}]   ;;  %s2397_s8 = inlined_call_operand.hbm [shape: f32[8,1024], index: 8, kind: output, shape index: {}]  }
   0x1   :  { %15 = vsyncpa [#allocation3 + $0x1], 0  ;;  %s2042_s27 = smov 0   ;;  %s2044_s28 = smov 0  }
   0x2   :  { %s2046_s29 = smov 0   ;;  %s2048_s30 = smov 0  }
   0x3 LB: > { %s2063_s9 = sadd.s32 4294967295, %s1986_s30   ;;  %s1744_s10 = sadd.s32 4294967294, %s1986_s30   ;;  %s1986_s30 = sphi %s2048_s30, %s2414_s30   ;;  %s1982_s29 = sphi %s2046_s29, %s2413_s29   ;;  %s1978_s28 = sphi %s2044_s28, %s2412_s28   ;;  %s1974_s27 = sphi %s2042_s27, %s2411_s27  }
   0x4   : > { %s2067_s11 = sadd.s32 1, %s1986_s30   ;;  %s201_s12 = sadd.s32 1, %s1982_s29 }
   0x5   : > { %s198_s13 = ssub.s32 %s1986_s30, %s2067_s11  ;;  %p211_p0 = scmp.ne.s32.totalorder %s1982_s29, %s1978_s28 }
   0x6   : > { %p199_p1 = scmp.eq.s32.totalorder %s198_s13, 0  ;;  %p212_p2 = scmp.eq.s32.totalorder %s2063_s9, 3 }
   0x7   : > { %p217_p3 = scmp.ne.s32.totalorder %s1978_s28, %s1974_s27  ;;  %p218_p4 = scmp.eq.s32.totalorder %s1744_s10, 3 }
   0x8   : > { %s2078_s14 = scalar_select %p199_p1, %s1982_s29, %s201_s12  }
   0x9   : > { %p2080_p5 = por %p212_p2, %p211_p0  ;;  %p2084_p6 = por %p218_p4, %p217_p3 }
   0xa   : > { %p1747_p7 = scmp.ge.s32.totalorder %s1986_s30, 1  ;;  %p266_p8 = scmp.lt.s32.totalorder %s1986_s30, 5 }
   0xc   : > { %p267_p9 = pnand %p1747_p7, %p266_p8 }
   0xe   : > { %270 = sbr.rel (%p267_p9) target bundleno = 1059 (0x423), region = 52 }
  0x13   : > { %s1749_s17 = sshll.u32 %s2063_s9, 1  ;;  %vm551_vm0 = vcmask 1040384   ;;  %v2398_v0 = vmov 0   ;;  %vm552_vm1 = vcmask 1041408   ;;  %v1989_v1 = vmov 65535   ;;  %v1901_v16 = vld [vmem:[%s2390_s1] sm:$0xff]  }
  0x14   : > { %p301_p10 = scmp.lt.s32.totalorder %s1749_s17, 7  ;;  %593 = vmatprep.mubr.bf16.mxu0 %v2398_v0  ;;  %668 = vmatprep.mubr.bf16.mxu1 %v2398_v0  ;;  %v553_v2 = vsel %vm551_vm0, 4294967295, %v1989_v1  ;;  %vm544_vm3 = vcmask 23552   ;;  %v1990_v22 = vmov 683565275   ;;  %v1903_v40 = vld [vmem:[%s2390_s1 + $0x8] sm:$0xff]  }
  0x15   : > { %1897 = vset.pattern.permute.xlu0 %v2398_v0  ;;  %1898 = vset.pattern.permute.xlu1 %v2398_v0  ;;  %v2101_v5 = vsel %vm552_vm1, %v553_v2, 0  ;;  %v1991_v24 = vmov 2475754826   ;;  %v1992_v26 = vmov 2131351028   ;;  %s297_s13 = sand.u32 1, %s1978_s28  }
  0x16   : > { %s2416_s17 = smov (!%p301_p10, %s1749_s17), 7  ;;  %v1993_v28 = vmov 2102212464   ;;  %v1994_v30 = vmov 920167782   ;;  %s1996_s25 = smov [#allocation2]  }
  0x17   : > { %s1750_s18 = sshll.u32 %s2416_s17, 2  ;;  %v1995_v38 = vmov 1326507024   ;;  %s1748_s17 = sshll.u32 %s297_s13, 4 }
  0x18   : > { %s304_s21 = scalar_lea.vmem %s2389_s0, %s1750_s18  ;;  %s1845_s18 = sshll.u32 %s2063_s9, 8 }
  0x19   : > { %v2098_v3 = vld [vmem:[%s304_s21] sm:$0x77]  ;;  %s299_s19 = scalar_lea.vmem [#allocation2], %s1748_s17  ;;  %s2348_s23 = scalar_lea.hbm %s2397_s8, %s1845_s18 }
  0x1a   : > { %v321_v4 = vand.u32 2139095040, %v2098_v3  ;;  %v318_v6 = vand.u32 2147483647, %v2098_v3  ;;  %v314_v7 = vcombine.high %v2098_v3, %v2098_v3  ;;  %v316_v8 = vpack.c.bf16 %v2098_v3, %v2098_v3  ;;  %s1685_s20 = sshll.u32 %s299_s19, 4  ;;  %s1671_s9 = scalar_lea.sflag [#allocation3], %s297_s13  ;;  %s2350_s20 = int_to_ptr.vmem [resolvable:$true] %s1685_s20 }
  0x1b   : > { %vm320_vm10 = vcmp.lt.s32.totalorder %v2098_v3, 0  ;;  %s1926_s24 = scalar_lea.vmem %s2350_s20, 256  ;;  %s1930_s26 = sshll.u32 %s1996_s25, 4  ;;  %s1931_s26 = int_to_ptr.vmem [resolvable:$false] %s1930_s26 }
  0x1c   : > { %v322_v9 = vshrl.u32 %v321_v4, 23  ;;  %v317_v10 = vpack.c.bf16 %v314_v7, %v314_v7  ;;  %v631_v12 = vand.u32 %v2101_v5, %v316_v8  ;;  %v325_v13 = vand.u32 8388607, %v318_v6  ;;  %p1927_p11 = scmp.ne.s32.totalorder %s2350_s20, %s1926_s24  ;;  %s1932_s10 = scalar_lea.vmem %s1931_s26, 512 }
  0x1d   : > { %vm319_vm11 = vcmp.le.f32.partialorder %v318_v6, 0.7853982  ;;  %p1933_p0 = scmp.lt.s32.totalorder %s2350_s20, %s1931_s26  ;;  %p1934_p1 = scmp.lt.s32.totalorder %s1932_s10, %s1926_s24 }
  0x1e   : > { %v1751_v11 = vadd.s32 4294967169, %v322_v9  ;;  %v634_v14 = vand.u32 %v2101_v5, %v317_v10  ;;  %v326_v17 = vor.u32 8388608, %v325_v13  ;;  %p1928_p12 = pnand %p1927_p11, %p2080_p5 }
  0x1f   : > { %p1935_p2 = por %p1934_p1, %p1933_p0 }
  0x20   : > { %v328_v15 = vadd.s32 1, %v1751_v11  ;;  %650 = vmatprep.subr.bf16.mxu1 %v634_v14  ;;  %v366_v32 = vshll.u32 %v326_v17, 8  ;;  %v1354_v11 = vld [vmem:[%s2392_s3 + $0x10] sm:$0xff]  ;;  %v1355_v14 = vld [vmem:[%s2392_s3 + $0x18] sm:$0xff]  ;;  %p1929_p13 = pneg %p1928_p12 }
  0x21   : > { %651 = vmatpush1.bf16.msra.mxu1 %v631_v12  ;;  %v1352_v12 = vld [vmem:[%s2392_s3] sm:$0xff]  ;;  %1368 = vperm.xlu0 %1897, %v1354_v11  }
  0x22   : > { %vm329_vm2 = vcmp.gt.s32.totalorder %v328_v15, 0  ;;  %1358 = vperm.xlu1 %1898, %v1352_v12   ;;  %p1936_p3 = pnand %p1935_p2, %p1929_p13 }
  0x23   : > { %v330_v18 = vsel %vm329_vm2, %v328_v15, 0  ;;  %v1353_v15 = vld [vmem:[%s2392_s3 + $0x8] sm:$0xff]  ;;  %vm410_vm2 = vweird.f32 %v2098_v3 }
  0x24   : > { %v331_v19 = vshrl.u32 %v330_v18, 5  ;;  %v332_v20 = vand.u32 31, %v330_v18  ;;  %1765 = vmatmul.mubr.msk.bf16.vlgmr.msra.gmra.mxu1 %vm544_vm3, %v1901_v16  ;;  %v1402_v18 = vld [vmem:[%s2394_s5 + $0x10] sm:$0xff] }
  0x25   : > { %678 = vmatprep.mubr.bf16.mxu1 %v2398_v0  ;;  %1373 = vperm.xlu0 %1897, %v1355_v14  }
  0x26   : > { %v333_v21 = vsub.s32 32, %v332_v20  ;;  %v335_v23 = vshll.u32 %v1990_v22, %v332_v20  ;;  %v338_v25 = vshll.u32 %v1991_v24, %v332_v20  ;;  %v341_v27 = vshll.u32 %v1992_v26, %v332_v20  ;;  %1363 = vperm.xlu1 %1898, %v1353_v15   ;;  %v1900_v15 = vld [vmem:[%s2391_s2] sm:$0xff]  }
  0x27   : > { %v344_v29 = vshll.u32 %v1993_v28, %v332_v20  ;;  %v347_v31 = vshll.u32 %v1994_v30, %v332_v20  ;;  %vm350_vm4 = vcmp.lt.s32.totalorder %v331_v19, 1  ;;  %vm351_vm5 = vcmp.lt.s32.totalorder %v331_v19, 2 }
  0x28   : > { %v334_v33 = vshrl.u32 %v1990_v22, %v333_v21  ;;  %v336_v34 = vshrl.u32 %v1991_v24, %v333_v21  ;;  %v339_v35 = vshrl.u32 %v1992_v26, %v333_v21  ;;  %v342_v36 = vshrl.u32 %v1993_v28, %v333_v21  ;;  %v1401_v26 = vld [vmem:[%s2394_s5 + $0x8] sm:$0xff] }
  0x29   : > { %v345_v37 = vshrl.u32 %v1994_v30, %v333_v21  ;;  %v348_v39 = vshrl.u32 %v1995_v38, %v333_v21  ;;  %vm352_vm6 = vcmp.lt.s32.totalorder %v331_v19, 3  ;;  %vm353_vm7 = vcmp.lt.s32.totalorder %v331_v19, 4  ;;  %v1403_v19 = vld [vmem:[%s2394_s5 + $0x18] sm:$0xff]  ;;  %1416 = vperm.xlu0 %1897, %v1402_v18  }
  0x2a   : > { %v337_v41 = vor.u32 %v336_v34, %v335_v23  ;;  %v340_v42 = vor.u32 %v339_v35, %v338_v25  ;;  %v343_v43 = vor.u32 %v342_v36, %v341_v27  ;;  %1421 = vperm.xlu1 %1898, %v1403_v19   ;;  %v1400_v25 = vld [vmem:[%s2394_s5] sm:$0xff] }
  0x2b   : > { %v346_v44 = vor.u32 %v345_v37, %v344_v29  ;;  %v349_v45 = vor.u32 %v348_v39, %v347_v31  ;;  %v1833_v31 = vld [vmem:[%s2394_s5 + $0x30] sm:$0xff]  ;;  %v1831_v36 = vld [vmem:[%s2394_s5 + $0x20] sm:$0xff]  ;;  %v1832_v37 = vld [vmem:[%s2394_s5 + $0x28] sm:$0xff] }
  0x2c   : > { %v354_v46 = vsel %vm350_vm4, %v334_v33, %v337_v41  ;;  %v355_v47 = vsel %vm353_vm7, %v343_v43, 2102212464  ;;  %v358_v48 = vsel %vm350_vm4, %v337_v41, %v340_v42  ;;  %v362_v49 = vsel %vm350_vm4, %v340_v42, %v343_v43  ;;  %1766 = vmatmul.mubr.msk.bf16.gmra.mxu1 %vm544_vm3, %v1903_v40  ;;  %v1618_v41 = vld [vmem:[%s2396_s7] sm:$0xff] }
  0x2d   : > { %v356_v50 = vsel %vm352_vm6, %v340_v42, %v355_v47  ;;  %v359_v51 = vsel %vm353_vm7, %v346_v44, 920167782  ;;  %v363_v52 = vsel %vm353_vm7, %v349_v45, 1326507024  ;;  %850 = vmatprep.mubr.bf16.mxu1 %v2398_v0  ;;  %1406 = vperm.xlu0 %1897, %v1400_v25  }
  0x2e   : > { %v360_v53 = vsel %vm352_vm6, %v343_v43, %v359_v51  ;;  %v364_v54 = vsel %vm352_vm6, %v346_v44, %v363_v52  ;;  %v357_v55 = vsel %vm351_vm5, %v354_v46, %v356_v50  ;;  %1411 = vperm.xlu1 %1898, %v1401_v26  }
  0x2f   : > { %v361_v56 = vsel %vm351_vm5, %v358_v48, %v360_v53  ;;  %v365_v57 = vsel %vm351_vm5, %v362_v49, %v364_v54  ;;  %v373_v62 = vmul.u32 %v366_v32, %v357_v55 }
  0x30   : > { %v2131_v58 = vmul.u32.u64.low %v366_v32, %v365_v57  ;;  %v2132_v59 = vmul.u32.u64.high %v366_v32, %v365_v57, %v2131_v58  ;;  %v2134_v60 = vmul.u32.u64.low %v366_v32, %v361_v56  ;;  %v2135_v61 = vmul.u32.u64.high %v366_v32, %v361_v56, %v2134_v60  ;;  %v1834_v32 = vld [vmem:[%s2394_s5 + $0x38] sm:$0xff] }
  0x31   : > { %1528 = vperm.xlu0 %1897, %v1833_v31  }
  0x32   : > { %vm375_vm8 = vc.u32 %v2132_v59, %v2134_v60  ;;  %v376_v63 = vadd.s32 1, %v2135_v61  ;;  %v374_v20 = vadd.s32 %v2134_v60, %v2132_v59  ;;  %1533 = vperm.xlu1 %1898, %v1834_v32  }
  0x34   : > { %v377_v1 = vsel %vm375_vm8, %v376_v63, %v2135_v61 }
  0x35   : > { %v378_v2 = vadd.s32 %v377_v1, %v373_v62  ;;  %1518 = vperm.xlu0 %1897, %v1831_v36  }
  0x36   : > { %1523 = vperm.xlu1 %1898, %v1832_v37  }
  0x37   : > { %v379_v4 = vadd.s32 536870912, %v378_v2 }
  0x39   : > { %v380_v7 = vshrl.u32 %v379_v4, 30  ;;  %1621 = vperm.xlu0 %1897, %v1618_v41  }
  0x3b   : > { %v381_v8 = vshll.u32 %v380_v7, 30  ;;  %v404_v39 = vsub.s32 4, %v380_v7 }
  0x3d   : > { %v382_v9 = vsub.s32 %v378_v2, %v381_v8  ;;  %v405_v43 = vsel %vm320_vm10, %v404_v39, %v380_v7 }
  0x3e   : > { %v407_v45 = vsel %vm319_vm11, 0, %v405_v43 }
  0x3f   : > { %v384_v10 = vsub.s32 0, %v382_v9  ;;  %v411_v46 = vadd.s32 3, %v407_v45  ;;  %v515_v48 = vand.u32 3, %v407_v45 }
  0x41   : > { %v1752_v13 = vmin.u32 %v384_v10, %v382_v9  ;;  %v412_v47 = vand.u32 3, %v411_v46  ;;  %vm520_vm13 = vcmp.eq.s32.totalorder %v515_v48, 2  ;;  %vm517_vm15 = vcmp.eq.s32.totalorder %v515_v48, 0 }
  0x42   : > { %vm516_vm1 = vcmp.lt.s32.totalorder %v515_v48, 2 }
  0x43   : > { %v386_v16 = vclz %v1752_v13  ;;  %vm417_vm12 = vcmp.eq.s32.totalorder %v412_v47, 2  ;;  %vm414_vm14 = vcmp.eq.s32.totalorder %v412_v47, 0  ;;  %vm413_vm0 = vcmp.lt.s32.totalorder %v412_v47, 2  ;;  %v1909_v47 = vld [vmem:[%s2391_s2 + $0x40] sm:$0xff]  }
  0x45   : > { %v1753_v17 = vadd.s32 4294967294, %v386_v16 }
  0x47   : > { %vm1754_vm9 = vcmp.lt.s32.totalorder %v1753_v17, 0 }
  0x48   : > { %v389_v21 = vsel %vm1754_vm9, 0, %v1753_v17 }
  0x49   : > { %v390_v22 = vsub.s32 32, %v389_v21  ;;  %v391_v23 = vshll.u32 %v382_v9, %v389_v21  ;;  %v394_v24 = vsub.s32 4294967266, %v389_v21 }
  0x4b   : > { %v392_v27 = vshrl.u32 %v374_v20, %v390_v22  ;;  %v395_v28 = vadd.s32 127, %v394_v24 }
  0x4d   : > { %v393_v29 = vor.u32 %v392_v27, %v391_v23  ;;  %v396_v30 = vshll.u32 %v395_v28, 23 }
  0x4f   : > { %v397_v33 = vor.u32 4788187, %v396_v30  ;;  %v400_v34 = vcvt.s32.f32 %v393_v29  ;;  %v1905_v29 = vld [vmem:[%s2391_s2 + $0x20] sm:$0xff]  }
  0x51   : > { %v398_v35 = vand.u32 2147483647, %v397_v33 }
  0x53   : > { %v401_v38 = vmul.f32 %v400_v34, %v398_v35  ;;  %v1902_v34 = vld [vmem:[%s2391_s2 + $0x8] sm:$0xff]  }
  0x55   : > { %v402_v40 = vxor.u32 2147483648, %v401_v38 }
  0x57   : > { %v403_v42 = vsel %vm320_vm10, %v402_v40, %v401_v38  ;;  %v1907_v40 = vld [vmem:[%s2391_s2 + $0x28] sm:$0xff]  }
  0x58   : > { %v406_v44 = vsel %vm319_vm11, %v2098_v3, %v403_v42  ;;  %v1904_v42 = vld [vmem:[%s2391_s2 + $0x10] sm:$0xff]  }
  0x59   : > { %1922 = vcosq.f32 %v406_v44 }
  0x5a   : > { %1924 = vsinq.f32 %v406_v44 }
  0x66   : > { %v1923_v49 = vpop.eup %1922 }
  0x67   : > { %v1925_v6 = vpop.eup %1924  ;;  %v418_v50 = vxor.u32 2147483648, %v1923_v49 }
  0x68   : > { %v415_v51 = vxor.u32 2147483648, %v1925_v6 }
  0x69   : > { %v419_v52 = vsel %vm417_vm12, %v418_v50, %v1925_v6  ;;  %v522_v53 = vsel %vm520_vm13, %v418_v50, %v1925_v6  ;;  %v1906_v6 = vld [vmem:[%s2391_s2 + $0x18] sm:$0xff]  }
  0x6a   : > { %v416_v54 = vsel %vm414_vm14, %v1923_v49, %v415_v51  ;;  %v519_v55 = vsel %vm517_vm15, %v1923_v49, %v415_v51 }
  0x6b   : > { %v420_v56 = vsel %vm413_vm0, %v416_v54, %v419_v52  ;;  %v523_v57 = vsel %vm516_vm1, %v519_v55, %v522_v53  ;;  %v1911_v52 = vld [vmem:[%s2391_s2 + $0x48] sm:$0xff]   ;;  %v1908_v54 = vld [vmem:[%s2391_s2 + $0x30] sm:$0xff]  }
  0x6c   : > { %v421_v58 = vsel %vm410_vm2, nan, %v420_v56  ;;  %v524_v59 = vsel %vm410_vm2, nan, %v523_v57  ;;  %v1913_v57 = vld [vmem:[%s2391_s2 + $0x60] sm:$0xff]  }
  0x6d   : > { %v530_v60 = vcombine.high %v421_v58, %v421_v58  ;;  %v782_v61 = vmul.f32 2.0, %v421_v58  ;;  %v532_v62 = vpack.c.bf16 %v421_v58, %v421_v58  ;;  %v695_v63 = vcombine.high %v524_v59, %v524_v59 }
  0x6e   : > { %v697_v9 = vpack.c.bf16 %v524_v59, %v524_v59 }
  0x6f   : > { %v533_v1 = vpack.c.bf16 %v530_v60, %v530_v60  ;;  %v783_v2 = vmul.f32 %v782_v61, %v524_v59  ;;  %v784_v4 = vmul.f32 %v782_v61, %v421_v58  ;;  %v556_v7 = vand.u32 %v2101_v5, %v532_v62  ;;  %v1910_v58 = vld [vmem:[%s2391_s2 + $0x38] sm:$0xff]   ;;  %v1915_v60 = vld [vmem:[%s2391_s2 + $0x68] sm:$0xff]   ;;  %v1912_v61 = vld [vmem:[%s2391_s2 + $0x50] sm:$0xff]  }
  0x70   : > { %v698_v8 = vpack.c.bf16 %v695_v63, %v695_v63  ;;  %v716_v18 = vand.u32 %v697_v9, %v2101_v5  ;;  %v1914_v63 = vld [vmem:[%s2391_s2 + $0x58] sm:$0xff]  }
  0x71   : > { %v559_v3 = vand.u32 %v2101_v5, %v533_v1  ;;  %v792_v10 = vcombine.high %v783_v2, %v783_v2  ;;  %v794_v11 = vpack.c.bf16 %v783_v2, %v783_v2  ;;  %v785_v12 = vsub.f32 1.0, %v784_v4  ;;  %v1917_v1 = vld [vmem:[%s2391_s2 + $0x78] sm:$0xff]  }
  0x72   : > { %v719_v13 = vand.u32 %v698_v8, %v2101_v5  ;;  %v972_v14 = vmul.f32 2.0, %v783_v2 }
  0x73   : > { %575 = vmatprep.subr.bf16.mxu0 %v559_v3  ;;  %v795_v16 = vpack.c.bf16 %v792_v10, %v792_v10  ;;  %v885_v17 = vcombine.high %v785_v12, %v785_v12  ;;  %v813_v22 = vand.u32 %v794_v11, %v2101_v5  ;;  %v887_v39 = vpack.c.bf16 %v785_v12, %v785_v12 }
  0x74   : > { %576 = vmatpush1.bf16.msra.mxu0 %v556_v7  ;;  %v973_v19 = vmul.f32 %v972_v14, %v785_v12  ;;  %v974_v20 = vmul.f32 %v972_v14, %v783_v2 }
  0x75   : > { %735 = vmatprep.subr.bf16.mxu0 %v719_v13  ;;  %v816_v21 = vand.u32 %v795_v16, %v2101_v5  ;;  %v888_v23 = vpack.c.bf16 %v885_v17, %v885_v17  ;;  %v906_v43 = vand.u32 %v887_v39, %v2101_v5 }
  0x76   : > { %v982_v24 = vcombine.high %v973_v19, %v973_v19  ;;  %v984_v25 = vpack.c.bf16 %v973_v19, %v973_v19  ;;  %v975_v26 = vsub.f32 1.0, %v974_v20  ;;  %v1162_v27 = vmul.f32 2.0, %v973_v19 }
  0x77   : > { %1761 = vmatmul.mubr.msk.bf16.vlgmr.msra.gmra.mxu0 %vm544_vm3, %v1900_v15  ;;  %832 = vmatprep.subr.bf16.mxu1 %v816_v21  ;;  %v909_v28 = vand.u32 %v888_v23, %v2101_v5 }
  0x78   : > { %603 = vmatprep.mubr.bf16.mxu0 %v2398_v0  ;;  %736 = vmatpush1.bf16.msra.mxu0 %v716_v18  ;;  %v985_v30 = vpack.c.bf16 %v982_v24, %v982_v24  ;;  %v1003_v31 = vand.u32 %v984_v25, %v2101_v5  ;;  %v1163_v32 = vmul.f32 %v1162_v27, %v975_v26 }
  0x79   : > { %833 = vmatpush1.bf16.msra.mxu1 %v813_v22  ;;  %925 = vmatprep.subr.bf16.mxu0 %v909_v28  ;;  %v1075_v36 = vcombine.high %v975_v26, %v975_v26  ;;  %v1164_v46 = vmul.f32 %v1162_v27, %v973_v19  ;;  %v1077_v51 = vpack.c.bf16 %v975_v26, %v975_v26 }
  0x7a   : > { %v1006_v33 = vand.u32 %v985_v30, %v2101_v5  ;;  %v1172_v35 = vcombine.high %v1163_v32, %v1163_v32  ;;  %v1174_v45 = vpack.c.bf16 %v1163_v32, %v1163_v32 }
  0x7b   : > { %v1078_v41 = vpack.c.bf16 %v1075_v36, %v1075_v36  ;;  %v1165_v49 = vsub.f32 1.0, %v1164_v46  ;;  %v1096_v55 = vand.u32 %v1077_v51, %v2101_v5 }
  0x7c   : > { %1781 = vmatmul.mubr.msk.bf16.vlgmr.msra.gmra.mxu1 %vm544_vm3, %v1905_v29  ;;  %1022 = vmatprep.subr.bf16.mxu1 %v1006_v33  ;;  %v1175_v37 = vpack.c.bf16 %v1172_v35, %v1172_v35  ;;  %v1193_v48 = vand.u32 %v1174_v45, %v2101_v5 }
  0x7d   : > { %860 = vmatprep.mubr.bf16.mxu1 %v2398_v0  ;;  %1023 = vmatpush1.bf16.msra.mxu1 %v1003_v31  ;;  %v1099_v44 = vand.u32 %v1078_v41, %v2101_v5  ;;  %v1265_v50 = vcombine.high %v1165_v49, %v1165_v49  ;;  %v1267_v59 = vpack.c.bf16 %v1165_v49, %v1165_v49 }
  0x7e   : > { %v1196_v38 = vand.u32 %v1175_v37, %v2101_v5 }
  0x7f   : > { %1762 = vmatmul.mubr.msk.bf16.gmra.mxu0 %vm544_vm3, %v1902_v34  ;;  %v1268_v53 = vpack.c.bf16 %v1265_v50, %v1265_v50  ;;  %v1286_v62 = vand.u32 %v1267_v59, %v2101_v5 }
  0x80   : > { %753 = vmatprep.mubr.bf16.mxu0 %v2398_v0  ;;  %1212 = vmatprep.subr.bf16.mxu1 %v1196_v38 }
  0x81   : > { %v1289_v56 = vand.u32 %v1268_v53, %v2101_v5  ;;  %v1916_v5 = vld [vmem:[%s2391_s2 + $0x70] sm:$0xff]  }
  0x84   : > { %1782 = vmatmul.mubr.msk.bf16.gmra.mxu1 %vm544_vm3, %v1907_v40 }
  0x85   : > { %1040 = vmatprep.mubr.bf16.mxu1 %v2398_v0 }
  0x87   : > { %1773 = vmatmul.mubr.msk.bf16.vlgmr.msra.gmra.mxu0 %vm544_vm3, %v1904_v42 }
  0x88   : > { %763 = vmatprep.mubr.bf16.mxu0 %v2398_v0  ;;  %926 = vmatpush1.bf16.msra.mxu0 %v906_v43 }
  0x89   : > { %1115 = vmatprep.subr.bf16.mxu0 %v1099_v44 }
  0x8c   : > { %1797 = vmatmul.mubr.msk.bf16.vlgmr.msra.gmra.mxu1 %vm544_vm3, %v1909_v47 }
  0x8d   : > { %1050 = vmatprep.mubr.bf16.mxu1 %v2398_v0  ;;  %1213 = vmatpush1.bf16.msra.mxu1 %v1193_v48 }
  0x8f   : > { %1774 = vmatmul.mubr.msk.bf16.gmra.mxu0 %vm544_vm3, %v1906_v6 }
  0x90   : > { %943 = vmatprep.mubr.bf16.mxu0 %v2398_v0 }
  0x94   : > { %1798 = vmatmul.mubr.msk.bf16.gmra.mxu1 %vm544_vm3, %v1911_v52 }
  0x95   : > { %1230 = vmatprep.mubr.bf16.mxu1 %v2398_v0 }
  0x97   : > { %1789 = vmatmul.mubr.msk.bf16.vlgmr.msra.gmra.mxu0 %vm544_vm3, %v1908_v54 }
  0x98   : > { %953 = vmatprep.mubr.bf16.mxu0 %v2398_v0  ;;  %1116 = vmatpush1.bf16.msra.mxu0 %v1096_v55 }
  0x99   : > { %1305 = vmatprep.subr.bf16.mxu0 %v1289_v56 }
  0x9c   : > { %1813 = vmatmul.mubr.msk.bf16.vlgmr.msra.gmra.mxu1 %vm544_vm3, %v1913_v57 }
  0x9d   : > { %1240 = vmatprep.mubr.bf16.mxu1 %v2398_v0 }
  0x9f   : > { %1790 = vmatmul.mubr.msk.bf16.gmra.mxu0 %vm544_vm3, %v1910_v58 }
  0xa0   : > { %1133 = vmatprep.mubr.bf16.mxu0 %v2398_v0 }
  0xa4   : > { %1814 = vmatmul.mubr.msk.bf16.gmra.mxu1 %vm544_vm3, %v1915_v60 }
  0xa5   : > { %1473 = vmatprep.mubr.bf16.mxu1 %v2398_v0 }
  0xa7   : > { %1805 = vmatmul.mubr.msk.bf16.vlgmr.msra.gmra.mxu0 %vm544_vm3, %v1912_v61 }
  0xa8   : > { %1143 = vmatprep.mubr.bf16.mxu0 %v2398_v0  ;;  %1306 = vmatpush1.bf16.msra.mxu0 %v1286_v62 }
  0xaf   : > { %1806 = vmatmul.mubr.msk.bf16.gmra.mxu0 %vm544_vm3, %v1914_v63 }
  0xb0   : > { %1323 = vmatprep.mubr.bf16.mxu0 %v2398_v0 }
  0xb7   : > { %1821 = vmatmul.mubr.msk.bf16.vlgmr.msra.gmra.mxu0 %vm544_vm3, %v1916_v5 }
  0xb8   : > { %1333 = vmatprep.mubr.bf16.mxu0 %v2398_v0 }
  0xbf   : > { %1822 = vmatmul.mubr.msk.bf16.gmra.mxu0 %vm544_vm3, %v1917_v1  ;;  %vm1434_vm3 = vcmask 261120  }
  0xc0   : > { %1584 = vmatprep.mubr.bf16.mxu0 %v2398_v0 }
  0xe4   : > { %v670_v2 = vpop.f32.mrf.mxu1 }
  0xe6   : > { %v2281_v4 = vpop.f32.mrf.mxu1 }
  0xe8   : > { %v674_v7 = vpop.f32.mrf.mxu1 }
  0xea   : > { %v676_v8 = vpop.f32.mrf.mxu1 }
  0xec   : > { %v680_v9 = vpop.f32.mrf.mxu1 }
  0xee   : > { %v682_v3 = vpop.f32.mrf.mxu1 }
  0xf0   : > { %v684_v10 = vpop.f32.mrf.mxu1 }
  0xf2   : > { %v2283_v13 = vpop.f32.mrf.mxu1 }
 0x137   : > { %v595_v11 = vpop.f32.mrf.mxu0 }
 0x138   : > { %v671_v50 = vadd.f32 %v670_v2, %v595_v11 }
 0x139   : > { %v597_v12 = vpop.f32.mrf.mxu0 }
 0x13b   : > { %v599_v14 = vpop.f32.mrf.mxu0 }
 0x13c   : > { %v852_v15 = vpop.f32.mrf.mxu1  ;;  %v675_v55 = vadd.f32 %v674_v7, %v599_v14 }
 0x13d   : > { %v601_v16 = vpop.f32.mrf.mxu0 }
 0x13e   : > { %v2285_v17 = vpop.f32.mrf.mxu1  ;;  %v677_v62 = vadd.f32 %v676_v8, %v601_v16 }
 0x13f   : > { %v605_v18 = vpop.f32.mrf.mxu0 }
 0x140   : > { %v856_v19 = vpop.f32.mrf.mxu1  ;;  %v681_v2 = vadd.f32 %v680_v9, %v605_v18 }
 0x141   : > { %v607_v20 = vpop.f32.mrf.mxu0 }
 0x142   : > { %v858_v21 = vpop.f32.mrf.mxu1  ;;  %v683_v1 = vadd.f32 %v682_v3, %v607_v20 }
 0x143   : > { %v609_v22 = vpop.f32.mrf.mxu0 }
 0x144   : > { %v2287_v23 = vpop.f32.mrf.mxu1 }
 0x145   : > { %v611_v24 = vpop.f32.mrf.mxu0 }
 0x146   : > { %v864_v25 = vpop.f32.mrf.mxu1 }
 0x147   : > { %v755_v26 = vpop.f32.mrf.mxu0 }
 0x148   : > { %v2289_v27 = vpop.f32.mrf.mxu1  ;;  %v774_v53 = vadd.f32 %v755_v26, %v671_v50  ;;  %v685_v26 = vadd.f32 %v684_v10, %v609_v22 }
 0x149   : > { %v757_v28 = vpop.f32.mrf.mxu0 }
 0x14a   : > { %v2291_v29 = vpop.f32.mrf.mxu1  ;;  %v871_v58 = vadd.f32 %v852_v15, %v774_v53 }
 0x14b   : > { %v759_v30 = vpop.f32.mrf.mxu0 }
 0x14c   : > { %v1042_v31 = vpop.f32.mrf.mxu1  ;;  %v776_v59 = vadd.f32 %v759_v30, %v675_v55 }
 0x14d   : > { %v761_v32 = vpop.f32.mrf.mxu0 }
 0x14e   : > { %v2293_v33 = vpop.f32.mrf.mxu1  ;;  %v873_v0 = vadd.f32 %v856_v19, %v776_v59  ;;  %v777_v11 = vadd.f32 %v761_v32, %v677_v62  ;;  %v1369_v62 = vpop.permute.xlu0 %1368 }
 0x14f   : > { %v765_v34 = vpop.f32.mrf.mxu0 }
 0x150   : > { %v1046_v35 = vpop.f32.mrf.mxu1  ;;  %v874_v53 = vadd.f32 %v858_v21, %v777_v11 }
 0x151   : > { %v767_v36 = vpop.f32.mrf.mxu0 }
 0x152   : > { %v2295_v37 = vpop.f32.mrf.mxu1  ;;  %v779_v50 = vadd.f32 %v767_v36, %v683_v1 }
 0x153   : > { %v769_v38 = vpop.f32.mrf.mxu0 }
 0x154   : > { %v2297_v40 = vpop.f32.mrf.mxu1  ;;  %v780_v8 = vadd.f32 %v769_v38, %v685_v26  ;;  %v876_v19 = vadd.f32 %v864_v25, %v779_v50 }
 0x155   : > { %v771_v39 = vpop.f32.mrf.mxu0  ;;  %2402 = vst [vmem:[#allocation5_spill] sm:$0xff] %v2297_v40 }
 0x156   : > { %v2299_v43 = vpop.f32.mrf.mxu1  ;;  %v877_v22 = vadd.f32 %v2289_v27, %v780_v8 }
 0x157   : > { %v945_v41 = vpop.f32.mrf.mxu0 }
 0x158   : > { %v2301_v46 = vpop.f32.mrf.mxu1  ;;  %v964_v61 = vadd.f32 %v945_v41, %v871_v58  ;;  %v687_v41 = vadd.f32 %v2283_v13, %v611_v24  ;;  %v1359_v13 = vpop.permute.xlu1 %1358 }
 0x159   : > { %v947_v42 = vpop.f32.mrf.mxu0  ;;  %2403 = vst [vmem:[#allocation6_spill] sm:$0xff] %v2301_v46 }
 0x15a   : > { %v2303_v49 = vpop.f32.mrf.mxu1  ;;  %v1061_v7 = vadd.f32 %v1042_v31, %v964_v61  ;;  %v781_v20 = vadd.f32 %v771_v39, %v687_v41 }
 0x15b   : > { %v949_v44 = vpop.f32.mrf.mxu0  ;;  %2404 = vst [vmem:[#allocation7_spill] sm:$0xff] %v2303_v49  ;;  %v673_v49 = vadd.f32 %v2281_v4, %v597_v12 }
 0x15c   : > { %v1232_v52 = vpop.f32.mrf.mxu1  ;;  %v966_v14 = vadd.f32 %v949_v44, %v873_v0  ;;  %v878_v25 = vadd.f32 %v2291_v29, %v781_v20  ;;  %v1364_v29 = vpop.permute.xlu1 %1363 }
 0x15d   : > { %v951_v45 = vpop.f32.mrf.mxu0  ;;  %v775_v40 = vadd.f32 %v757_v28, %v673_v49 }
 0x15e   : > { %v2305_v57 = vpop.f32.mrf.mxu1  ;;  %v1063_v4 = vadd.f32 %v1046_v35, %v966_v14  ;;  %v967_v12 = vadd.f32 %v951_v45, %v874_v53  ;;  %v2406_v45 = vld [vmem:[#allocation5_spill] sm:$0xff] }
 0x15f   : > { %v955_v47 = vpop.f32.mrf.mxu0  ;;  %2405 = vst [vmem:[#allocation8_spill] sm:$0xff] %v2305_v57  ;;  %v778_v57 = vadd.f32 %v765_v34, %v681_v2  ;;  %v872_v9 = vadd.f32 %v2285_v17, %v775_v40 }
 0x160   : > { %v1236_v5 = vpop.f32.mrf.mxu1  ;;  %v1064_v17 = vadd.f32 %v2295_v37, %v967_v12 }
 0x161   : > { %v957_v48 = vpop.f32.mrf.mxu0  ;;  %v875_v10 = vadd.f32 %v2287_v23, %v778_v57  ;;  %v965_v24 = vadd.f32 %v947_v42, %v872_v9 }
 0x162   : > { %v1238_v15 = vpop.f32.mrf.mxu1  ;;  %v969_v28 = vadd.f32 %v957_v48, %v876_v19 }
 0x163   : > { %v959_v6 = vpop.f32.mrf.mxu0  ;;  %v968_v34 = vadd.f32 %v955_v47, %v875_v10  ;;  %v1062_v27 = vadd.f32 %v2293_v33, %v965_v24  ;;  %v2407_v47 = vld [vmem:[#allocation6_spill] sm:$0xff] }
 0x164   : > { %v1242_v18 = vpop.f32.mrf.mxu1  ;;  %v970_v36 = vadd.f32 %v959_v6, %v877_v22  ;;  %v1066_v39 = vadd.f32 %v2299_v43, %v969_v28 }
 0x165   : > { %v961_v51 = vpop.f32.mrf.mxu0  ;;  %v1065_v48 = vadd.f32 %v2406_v45, %v968_v34 }
 0x166   : > { %v1244_v38 = vpop.f32.mrf.mxu1  ;;  %v971_v40 = vadd.f32 %v961_v51, %v878_v25  ;;  %v2409_v26 = vld [vmem:[#allocation8_spill] sm:$0xff] }
 0x167   : > { %v1135_v54 = vpop.f32.mrf.mxu0 }
 0x168   : > { %v1154_v16 = vadd.f32 %v1135_v54, %v1061_v7  ;;  %v1246_v58 = vpop.f32.mrf.mxu1 }
 0x169   : > { %v1137_v56 = vpop.f32.mrf.mxu0 }
 0x16a   : > { %v1251_v31 = vadd.f32 %v1232_v52, %v1154_v16  ;;  %v1067_v52 = vadd.f32 %v2407_v47, %v970_v36  ;;  %v1155_v57 = vadd.f32 %v1137_v56, %v1062_v27  ;;  %v1248_v14 = vpop.f32.mrf.mxu1  ;;  %v1422_v27 = vpop.permute.xlu1 %1421 }
 0x16b   : > { %v1139_v60 = vpop.f32.mrf.mxu0 }
 0x16c   : > { %v1156_v32 = vadd.f32 %v1139_v60, %v1063_v4  ;;  %v2408_v60 = vld [vmem:[#allocation7_spill] sm:$0xff]  ;;  %v1252_v50 = vadd.f32 %v2409_v26, %v1155_v57 }
 0x16d   : > { %v1141_v63 = vpop.f32.mrf.mxu0  ;;  %v1068_v43 = vadd.f32 %v2408_v60, %v971_v40 }
 0x16e   : > { %v1253_v44 = vadd.f32 %v1236_v5, %v1156_v32  ;;  %v1157_v49 = vadd.f32 %v1141_v63, %v1064_v17  ;;  %v1412_v47 = vpop.permute.xlu1 %1411 }
 0x16f   : > { %v1145_v46 = vpop.f32.mrf.mxu0 }
 0x170   : > { %v1158_v37 = vadd.f32 %v1145_v46, %v1065_v48  ;;  %v1254_v33 = vadd.f32 %v1238_v15, %v1157_v49  ;;  %v1374_v15 = vpop.permute.xlu0 %1373 }
 0x171   : > { %v1147_v30 = vpop.f32.mrf.mxu0 }
 0x172   : > { %v1159_v54 = vadd.f32 %v1147_v30, %v1066_v39  ;;  %v1255_v7 = vadd.f32 %v1242_v18, %v1158_v37 }
 0x173   : > { %v1149_v3 = vpop.f32.mrf.mxu0 }
 0x174   : > { %v1160_v51 = vadd.f32 %v1149_v3, %v1067_v52  ;;  %v1256_v1 = vadd.f32 %v1244_v38, %v1159_v54  ;;  %v1918_v38 = vld [vmem:[%s2393_s4] sm:$0xff]   ;;  %v1417_v48 = vpop.permute.xlu0 %1416 }
 0x175   : > { %v1151_v0 = vpop.f32.mrf.mxu0 }
 0x176   : > { %v1161_v63 = vadd.f32 %v1151_v0, %v1068_v43  ;;  %v1257_v56 = vadd.f32 %v1246_v58, %v1160_v51 }
 0x177   : > { %v1325_v21 = vpop.f32.mrf.mxu0 }
 0x178   : > { %v1344_v35 = vadd.f32 %v1325_v21, %v1251_v31  ;;  %v1258_v3 = vadd.f32 %v1248_v14, %v1161_v63  ;;  %v1920_v14 = vld [vmem:[%s2393_s4 + $0x10] sm:$0xff]  }
 0x179   : > { %v1327_v23 = vpop.f32.mrf.mxu0 }
 0x17a   : > { %v1376_v6 = vadd.f32 %v1359_v13, %v1344_v35  ;;  %v1345_v19 = vadd.f32 %v1327_v23, %v1252_v50  ;;  %v1919_v23 = vld [vmem:[%s2393_s4 + $0x8] sm:$0xff]  }
 0x17b   : > { %v1329_v42 = vpop.f32.mrf.mxu0 }
 0x17c   : > { %v1346_v55 = vadd.f32 %v1329_v42, %v1253_v44  ;;  %v1384_v2 = vmax.f32 %v1376_v6, 0.0  ;;  %v1377_v28 = vadd.f32 %v1359_v13, %v1345_v19  ;;  %v2410_v13 = vmov 0  }
 0x17d   : > { %v1331_v59 = vpop.f32.mrf.mxu0 }
 0x17e   : > { %v1378_v61 = vadd.f32 %v1364_v29, %v1346_v55  ;;  %v1347_v41 = vadd.f32 %v1331_v59, %v1254_v33  ;;  %v1385_v25 = vmax.f32 %v1377_v28, 0.0  ;;  %v1407_v55 = vpop.permute.xlu0 %1406 }
 0x17f   : > { %v1335_v5 = vpop.f32.mrf.mxu0 }
 0x180   : > { %v1386_v11 = vmax.f32 %v1378_v61, 0.0  ;;  %v1348_v16 = vadd.f32 %v1335_v5, %v1255_v7  ;;  %v1379_v9 = vadd.f32 %v1364_v29, %v1347_v41 }
 0x181   : > { %v1337_v30 = vpop.f32.mrf.mxu0 }
 0x182   : > { %v1396_v46 = vpack.c.bf16 %v1386_v11, %v1384_v2  ;;  %v1349_v8 = vadd.f32 %v1337_v30, %v1256_v1  ;;  %v1380_v22 = vadd.f32 %v1369_v62, %v1348_v16  ;;  %v1387_v32 = vmax.f32 %v1379_v9, 0.0  ;;  %v1921_v30 = vld [vmem:[%s2393_s4 + $0x18] sm:$0xff]  }
 0x183   : > { %v1339_v53 = vpop.f32.mrf.mxu0 }
 0x184   : > { %v1350_v20 = vadd.f32 %v1339_v53, %v1257_v56  ;;  %v1381_v10 = vadd.f32 %v1369_v62, %v1349_v8  ;;  %v1388_v21 = vmax.f32 %v1380_v22, 0.0  ;;  %v1397_v17 = vpack.c.bf16 %v1387_v32, %v1385_v25  ;;  %v1534_v8 = vpop.permute.xlu1 %1533  ;;  %v1529_v53 = vpop.permute.xlu0 %1528 }
 0x185   : > { %v1341_v4 = vpop.f32.mrf.mxu0 }
 0x186   : > { %v1382_v12 = vadd.f32 %v1374_v15, %v1350_v20  ;;  %v1351_v0 = vadd.f32 %v1341_v4, %v1258_v3  ;;  %v1389_v24 = vmax.f32 %v1381_v10, 0.0 }
 0x188   : > { %v1383_v18 = vadd.f32 %v1374_v15, %v1351_v0  ;;  %v1390_v31 = vmax.f32 %v1382_v12, 0.0  ;;  %v1524_v20 = vpop.permute.xlu1 %1523  ;;  %v1519_v12 = vpop.permute.xlu0 %1518 }
 0x18a   : > { %v1391_v34 = vmax.f32 %v1383_v18, 0.0  ;;  %v1398_v35 = vpack.c.bf16 %v1390_v31, %v1388_v21 }
 0x18c   : > { %v1399_v36 = vpack.c.bf16 %v1391_v34, %v1389_v24 }
 0x18e   : > { %1453 = vmatprep.subr.bf16.mxu1 %v1399_v36 }
 0x18f   : > { %1454 = vmatpush1.bf16.msra.mxu1 %v1398_v35 }
 0x190   : > { %1455 = vmatprep.subr.bf16.mxu1 %v1397_v17 }
 0x193   : > { %1456 = vmatpush1.bf16.msra.mxu1 %v1396_v46 }
 0x196   : > { %1825 = vmatmul.mubr.msk.bf16.vlgmr.msra.gmra.mxu1 %vm1434_vm3, %v1918_v38 }
 0x197   : > { %1483 = vmatprep.mubr.bf16.mxu1 %v2410_v13 }
 0x19e   : > { %1826 = vmatmul.mubr.msk.bf16.gmra.mxu1 %vm1434_vm3, %v1919_v23 }
 0x19f   : > { %1659 = vmatprep.mubr.bf16.mxu1 %v2410_v13 }
 0x256   : > { %v1475_v39 = vpop.f32.mrf.mxu1 }
 0x257   : > { %v1476_v33 = vadd.f32 %v1475_v39, %v1407_v55 }
 0x258   : > { %v1477_v40 = vpop.f32.mrf.mxu1 }
 0x259   : > { %v1478_v58 = vadd.f32 %v1477_v40, %v1407_v55  ;;  %v1494_v50 = vmax.f32 %v1476_v33, 0.0 }
 0x25a   : > { %v1479_v44 = vpop.f32.mrf.mxu1 }
 0x25b   : > { %v1480_v60 = vadd.f32 %v1479_v44, %v1412_v47  ;;  %v1495_v1 = vmax.f32 %v1478_v58, 0.0  ;;  %v1613_v44 = vld [vmem:[%s2395_s6] sm:$0xf] }
 0x25c   : > { %v1481_v45 = vpop.f32.mrf.mxu1 }
 0x25d   : > { %v1482_v54 = vadd.f32 %v1481_v45, %v1412_v47  ;;  %v1496_v2 = vmax.f32 %v1480_v60, 0.0 }
 0x25e   : > { %v1485_v49 = vpop.f32.mrf.mxu1 }
 0x25f   : > { %v1486_v57 = vadd.f32 %v1485_v49, %v1417_v48  ;;  %v1497_v51 = vmax.f32 %v1482_v54, 0.0  ;;  %v1507_v7 = vpack.c.bf16 %v1496_v2, %v1494_v50 }
 0x260   : > { %v1487_v42 = vpop.f32.mrf.mxu1 }
 0x261   : > { %v1488_v29 = vadd.f32 %v1487_v42, %v1417_v48  ;;  %v1498_v5 = vmax.f32 %v1486_v57, 0.0  ;;  %v1508_v26 = vpack.c.bf16 %v1497_v51, %v1495_v1 }
 0x262   : > { %v1489_v52 = vpop.f32.mrf.mxu1 }
 0x263   : > { %v1490_v6 = vadd.f32 %v1489_v52, %v1422_v27  ;;  %v1499_v61 = vmax.f32 %v1488_v29, 0.0 }
 0x264   : > { %v1491_v37 = vpop.f32.mrf.mxu1 }
 0x265   : > { %v1492_v59 = vadd.f32 %v1491_v37, %v1422_v27  ;;  %v1500_v43 = vmax.f32 %v1490_v6, 0.0  ;;  %v1622_v27 = vpop.permute.xlu0 %1621 }
 0x267   : > { %v1501_v62 = vmax.f32 %v1492_v59, 0.0  ;;  %v1509_v11 = vpack.c.bf16 %v1500_v43, %v1498_v5 }
 0x269   : > { %v1510_v63 = vpack.c.bf16 %v1501_v62, %v1499_v61 }
 0x26b   : > { %1564 = vmatprep.subr.bf16.mxu0 %v1510_v63 }
 0x26c   : > { %1565 = vmatpush1.bf16.msra.mxu0 %v1509_v11 }
 0x26d   : > { %1566 = vmatprep.subr.bf16.mxu0 %v1508_v26 }
 0x270   : > { %1567 = vmatpush1.bf16.msra.mxu0 %v1507_v7 }
 0x273   : > { %1837 = vmatmul.mubr.msk.bf16.vlgmr.msra.gmra.mxu0 %vm1434_vm3, %v1920_v14 }
 0x274   : > { %1594 = vmatprep.mubr.bf16.mxu0 %v2410_v13 }
 0x27b   : > { %1838 = vmatmul.mubr.msk.bf16.gmra.mxu0 %vm1434_vm3, %v1921_v30 }
 0x333   : > { %v1586_v56 = vpop.f32.mrf.mxu0 }
 0x334   : > { %v1587_v25 = vadd.f32 %v1586_v56, %v1519_v12 }
 0x335   : > { %v1588_v46 = vpop.f32.mrf.mxu0 }
 0x336   : > { %v1589_v28 = vadd.f32 %v1588_v46, %v1519_v12  ;;  %v1605_v39 = vmax.f32 %v1587_v25, 0.0 }
 0x337   : > { %v1590_v41 = vpop.f32.mrf.mxu0 }
 0x338   : > { %v1591_v31 = vadd.f32 %v1590_v41, %v1524_v20  ;;  %v1606_v35 = vmax.f32 %v1589_v28, 0.0 }
 0x339   : > { %v1592_v16 = vpop.f32.mrf.mxu0 }
 0x33a   : > { %v1593_v4 = vadd.f32 %v1592_v16, %v1524_v20  ;;  %v1607_v38 = vmax.f32 %v1591_v31, 0.0 }
 0x33b   : > { %v1596_v3 = vpop.f32.mrf.mxu0 }
 0x33c   : > { %v1597_v0 = vadd.f32 %v1596_v3, %v1529_v53  ;;  %v1608_v24 = vmax.f32 %v1593_v4, 0.0  ;;  %v1614_v40 = vpack.c.bf16 %v1607_v38, %v1605_v39 }
 0x33d   : > { %v1598_v19 = vpop.f32.mrf.mxu0 }
 0x33e   : > { %v1599_v9 = vadd.f32 %v1598_v19, %v1529_v53  ;;  %v1609_v36 = vmax.f32 %v1597_v0, 0.0  ;;  %v1615_v23 = vpack.c.bf16 %v1608_v24, %v1606_v35 }
 0x33f   : > { %v1600_v15 = vpop.f32.mrf.mxu0 }
 0x340   : > { %v1601_v10 = vadd.f32 %v1600_v15, %v1534_v8  ;;  %v1610_v34 = vmax.f32 %v1599_v9, 0.0 }
 0x341   : > { %v1602_v22 = vpop.f32.mrf.mxu0 }
 0x342   : > { %v1603_v18 = vadd.f32 %v1602_v22, %v1534_v8  ;;  %v1611_v32 = vmax.f32 %v1601_v10, 0.0 }
 0x344   : > { %v1612_v21 = vmax.f32 %v1603_v18, 0.0  ;;  %v1616_v13 = vpack.c.bf16 %v1611_v32, %v1609_v36 }
 0x346   : > { %v1617_v17 = vpack.c.bf16 %v1612_v21, %v1610_v34 }
 0x348   : > { %1639 = vmatprep.subr.bf16.mxu1 %v1617_v17 }
 0x349   : > { %1640 = vmatpush1.bf16.msra.mxu1 %v1616_v13 }
 0x34a   : > { %1641 = vmatprep.subr.bf16.mxu1 %v1615_v23 }
 0x34d   : > { %1642 = vmatpush1.bf16.msra.mxu1 %v1614_v40 }
 0x350   : > { %1839 = vmatmul.mubr.msk.bf16.vlgmr.msra.gmra.mxu1 %vm1434_vm3, %v1613_v44 }
 0x410   : > { %v1661_v45 = vpop.f32.mrf.mxu1 }
 0x411   : > { %v1662_v48 = vadd.f32 %v1661_v45, %v1622_v27 }
 0x412   : > { %v1663_v49 = vpop.f32.mrf.mxu1 }
 0x413   : > { %1668 = vst [vmem:[%s299_s19] sm:$0xff] %v1662_v48  ;;  %v1664_v42 = vadd.f32 %v1663_v49, %v1622_v27 }
 0x414   : > { %v1665_v47 = vpop.f32.mrf.mxu1 }
 0x415   : > { %1669 = vst [vmem:[%s299_s19 + $0x8] sm:$0xff] %v1664_v42 }
 0x416   : > { %v1666_v52 = vpop.f32.mrf.mxu1 }
 0x417   : > { %1939 = shalt.err (!%p1936_p3)
}
 0x418   : > { %s1940_s12 = scalar_lea.hbm %s2348_s23, 256  ;;  %s1944_s18 = scalar_lea.hbm %s2397_s8, 1024 }
 0x419   : > { %p1941_p4 = scmp.ne.s32.totalorder %s2348_s23, %s1940_s12  ;;  %p1945_p9 = scmp.lt.s32.totalorder %s2348_s23, %s2397_s8 }
 0x41a   : > { %p1946_p10 = scmp.lt.s32.totalorder %s1944_s18, %s1940_s12 }
 0x41b   : > { %p1942_p7 = pnand %p1941_p4, %p2080_p5 }
 0x41c   : > { %p1947_p11 = por %p1946_p10, %p1945_p9 }
 0x41d   : > { %p1943_p8 = pneg %p1942_p7 }
 0x41f   : > { %p1948_p12 = pnand %p1947_p11, %p1943_p8 }
 0x421   : > { %1951 = shalt.err (!%p1948_p12)
}
 0x422   : > { %1850 = dma.vmem_to_hbm [thread:$0]  (%p2080_p5), %s2350_s20, 256, %s2348_s23, %s1671_s9  }
 0x423 PF: > { %p1856_p13 = scmp.ge.s32.totalorder %s1986_s30, 2  ;;  %s1697_s22 = sand.u32 1, %s1974_s27  }
 0x424   : > { %s1698_s24 = scalar_lea.sflag [#allocation3], %s1697_s22 }
 0x425   : > { %p1853_p0 = pnand %p1856_p13, %p2084_p6 }
 0x427   : > { %p1854_p1 = pneg %p1853_p0 }
 0x429   : > { %1969 = dma.done.wait (%p1854_p1), %s1698_s24, 256  }
 0x42a   : > { %1971 = vsyncadd (%p1854_p1), %s1698_s24, 4294967040  ;;  %p18_p2 = scmp.ge.s32.totalorder %s2067_s11, 6   ;;  %s2411_s27 = smov %s1978_s28 }
 0x42b   : > { %s2412_s28 = smov %s1982_s29  ;;  %s2413_s29 = smov %s2078_s14 }
 0x42c   : > { %s2414_s30 = smov %s2067_s11  ;;  %20 = sbr.rel (!%p18_p2) target bundleno = 3 (0x3), region = 96 }
 0x431   :  { %1703 = vsyncpa [#allocation3], 1 }
 0x432   :  { %1705 = vsyncpa [#allocation3 + $0x1], 1 }

</bundles_post_ra>
